<compile_context>
chip_gen: v7x
topology: tpu7x:2x2x1
jax: 0.10.0
libtpu: 0.0.40
codegen_flags: <defaults>
</compile_context>

<pallas_src>
import functools

import jax
import jax.numpy as jnp
from jax.experimental import pallas as pl
from jax.experimental.pallas import tpu as pltpu


def _cond_entropy_kernel(x_ref, o_ref, *, batch_size, tile_b, inner_steps, needs_mask):
    """Adds one (tile_b, C) tile's entropy contribution into this split's (1,1) partial."""
    c = pl.program_id(0)   # core-split axis ("parallel")
    i = pl.program_id(1)   # batch-tile axis ("arbitrary"; output block resident across it)

    # Per-split accumulator init on the first inner step.
    @pl.when(i == 0)
    def _():
        o_ref[...] = jnp.zeros_like(o_ref)

    x = x_ref[...].astype(jnp.float32)                     # (tile_b, C), f32 math
    # TODO(synk): on v6e/v7x a bf16 max/subtract/exp path (f32 only for the row
    # sums / log and the scalar accumulator) would halve VPU+EUP pressure for
    # bf16 inputs; keep f32 on v5e (no bf16 VPU/EUP).

    # Numerically stable row-wise softmax statistics (class axis = dim 1).
    m = jnp.max(x, axis=1, keepdims=True)                  # (tile_b, 1)
    z = x - m                                              # (tile_b, C)
    e = jnp.exp(z)                                         # EUP
    s = jnp.sum(e, axis=1, keepdims=True)                  # (tile_b, 1)
    ez = jnp.sum(e * z, axis=1, keepdims=True)             # (tile_b, 1)

    # sum_c p*logp = sum_c (e/s)*(z - log s) = sum(e*z)/s - log(s)
    # Exact divide on a (tile_b, 1) vector (approx EUP reciprocal introduced a
    # systematic per-row bias that accumulates in the scalar sum).
    per_row = ez / s - jnp.log(s)                          # (tile_b, 1)

    if needs_mask:
        # Only reached when B % tile_b != 0.  Garbage in padded rows stays
        # confined to those rows, so masking the per-row result is sufficient.
        row = (c * inner_steps + i) * tile_b + jax.lax.broadcasted_iota(
            jnp.int32, (tile_b, 1), 0)
        per_row = jnp.where(row < batch_size, per_row, 0.0)

    o_ref[...] += jnp.sum(per_row, axis=0, keepdims=True)  # (1, 1) partial sum


def _round_up(x, m):
    return ((x + m - 1) // m) * m


def _round_down(x, m):
    return (x // m) * m


def _vmem_capacity_bytes():
    try:
        return int(pltpu.get_tpu_info().vmem_capacity_bytes)
    except Exception:
        return 64 * 1024 * 1024  # v7x per-TC physical -> safe lower bound everywhere


def conditional_entropy_loss(x, tile_b=None):
    """Pallas TPU implementation of ConditionalEntropyLoss.forward for (B, C) logits."""
    B, C = x.shape
    itemsize = jnp.dtype(x.dtype).itemsize

    # Sub-32-bit dtypes pack along sublanes: f32 -> 8, bf16 -> 16, int8/fp8 -> 32.
    sublane = 8 * max(1, 4 // itemsize)

    vmem_cap = _vmem_capacity_bytes()
    # Byte budget for the double-buffered input (both pipeline buffers):
    #   v5e/v6e (128 MiB physical) -> 40 MiB, v7x (64 MiB physical) -> 32 MiB.
    input_budget = min(40 * 1024 * 1024, vmem_cap // 2)
    per_buffer = input_budget // 2

    if tile_b is None:
        # Byte-based tiling: no row cap, so small-C / large-B tiles stay multi-MiB.
        tile_b = max(sublane, _round_down(per_buffer // (C * itemsize), sublane))
    tile_b = max(sublane, _round_down(tile_b, sublane))
    tile_b = min(tile_b, _round_up(B, sublane))   # never larger than the padded batch

    # TODO(synk): for vocab-scale C (where even sublane-min rows x C overflows the
    # budget, esp. on v7x's 64 MiB VMEM), add an inner "arbitrary" grid axis over C
    # with online-softmax running max/sum accumulators; here each block spans full C.

    total_tiles = pl.cdiv(B, tile_b)
    # Leading "parallel" split: lets v7x shard the batch over its 2 TensorCores
    # (each writes its own (1,1) partial); no measured effect on 1-TC chips.
    num_splits = 2 if (total_tiles >= 2 and total_tiles % 2 == 0) else 1
    inner_steps = total_tiles // num_splits
    needs_mask = (B % tile_b) != 0

    tile_bytes = tile_b * C * itemsize
    vmem_limit = int(min(vmem_cap, 2 * tile_bytes + 16 * 1024 * 1024))

    kernel = functools.partial(
        _cond_entropy_kernel,
        batch_size=B, tile_b=tile_b, inner_steps=inner_steps, needs_mask=needs_mask)

    partials = pl.pallas_call(
        kernel,
        out_shape=jax.ShapeDtypeStruct((num_splits, 1), jnp.float32),
        grid_spec=pltpu.PrefetchScalarGridSpec(
            num_scalar_prefetch=0,
            grid=(num_splits, inner_steps),
            in_specs=[pl.BlockSpec((tile_b, C),
                                   lambda c, i: (c * inner_steps + i, 0))],
            out_specs=pl.BlockSpec((1, 1), lambda c, i: (c, 0)),
        ),
        compiler_params=pltpu.CompilerParams(
            dimension_semantics=("parallel", "arbitrary"),
            vmem_limit_bytes=vmem_limit,
        ),
    )(x)

    # Final reduction + sign flip on the tiny (num_splits, 1) partials.
    return -jnp.sum(partials)


def _reference(x):
    # Pure-JAX reference mirroring the PyTorch module exactly.
    p = jax.nn.softmax(x, axis=1)
    logp = jax.nn.log_softmax(x, axis=1)
    b = jnp.sum(p * logp, axis=1)
    return -1.0 * jnp.sum(b, axis=0)


if __name__ == "__main__":
    key = jax.random.PRNGKey(0)

    # (1) Default byte-based tiling; B not a sublane multiple -> padded-row mask path.
    B, C = 20, 32
    x = jax.random.normal(key, (B, C), dtype=jnp.float32)
    loss = jax.block_until_ready(conditional_entropy_loss(x))
    ref = _reference(x)
    assert jnp.allclose(loss, ref, rtol=1e-4, atol=1e-4), (loss, ref)

    # (2) Forced small tile -> 4 tiles -> 2-way "parallel" split + multi-step
    #     accumulator per split (aligned, so no mask is emitted).
    x2 = jax.random.normal(jax.random.fold_in(key, 1), (32, C), dtype=jnp.float32)
    loss2 = jax.block_until_ready(conditional_entropy_loss(x2, tile_b=8))
    ref2 = _reference(x2)
    assert jnp.allclose(loss2, ref2, rtol=1e-4, atol=1e-4), (loss2, ref2)

    # (3) bf16 input -> dtype-aware 16-row sublane rounding; math still in f32.
    x3 = jax.random.normal(jax.random.fold_in(key, 2), (40, C), dtype=jnp.bfloat16)
    loss3 = jax.block_until_ready(conditional_entropy_loss(x3))
    ref3 = _reference(x3.astype(jnp.float32))
    assert jnp.allclose(loss3, ref3, rtol=1e-3, atol=1e-3), (loss3, ref3)

    print("KERNEL_OK")
</pallas_src>

<mosaic_0001>
module attributes {stable_mosaic.version = 11 : i64} {
  func.func @_cond_entropy_kernel(%arg0: i32, %arg1: i32, %arg2: memref<24x32xf32, #tpu.memory_space<vmem>>, %arg3: memref<1x1xf32, #tpu.memory_space<vmem>>) attributes {dimension_semantics = [#tpu.dimension_semantics<parallel>, #tpu.dimension_semantics<arbitrary>], iteration_bounds = array<i64: 1, 1>, scalar_prefetch = 0 : i64, scratch_operands = 0 : i64, tpu.core_type = #tpu.core_type<tc>, window_params = [{transform_indices = @transform_0, window_bounds = array<i64: 24, 32>}, {transform_indices = @transform_1, window_bounds = array<i64: 1, 1>}]} {
    %c0_i32 = arith.constant 0 : i32
    %0 = arith.cmpi eq, %arg1, %c0_i32 : i32
    %1 = arith.extui %0 : i1 to i32
    %c0_i32_0 = arith.constant 0 : i32
    %2 = arith.cmpi ne, %1, %c0_i32_0 : i32
    scf.if %2 {
      %cst_10 = arith.constant 0.000000e+00 : f32
      %32 = vector.broadcast %cst_10 : f32 to vector<1x1xf32>
      %c0_11 = arith.constant 0 : index
      %c0_12 = arith.constant 0 : index
      %33 = vector.load %arg3[%c0_11, %c0_12] : memref<1x1xf32, #tpu.memory_space<vmem>>, vector<1x1xf32>
      tpu.vector_store %arg3[%c0_11, %c0_12], %32 {strides = array<i32>} : memref<1x1xf32, #tpu.memory_space<vmem>>, vector<1x1xf32>,
    } else {
    }
    %c0 = arith.constant 0 : index
    %c0_1 = arith.constant 0 : index
    %3 = vector.load %arg2[%c0, %c0_1] : memref<24x32xf32, #tpu.memory_space<vmem>>, vector<24x32xf32>
    %cst = arith.constant dense<0xFF800000> : vector<24xf32>
    %4 = vector.multi_reduction <maximumf>, %3, %cst [1] : vector<24x32xf32> to vector<24xf32>
    %5 = vector.shape_cast %4 : vector<24xf32> to vector<24x1xf32>
    %6 = vector.broadcast %5 : vector<24x1xf32> to vector<24x32xf32>
    %7 = arith.subf %3, %6 : vector<24x32xf32>
    %8 = math.exp %7 : vector<24x32xf32>
    %cst_2 = arith.constant dense<0.000000e+00> : vector<24xf32>
    %9 = vector.multi_reduction <add>, %8, %cst_2 [1] : vector<24x32xf32> to vector<24xf32>
    %10 = vector.shape_cast %9 : vector<24xf32> to vector<24x1xf32>
    %11 = arith.mulf %8, %7 : vector<24x32xf32>
    %cst_3 = arith.constant dense<0.000000e+00> : vector<24xf32>
    %12 = vector.multi_reduction <add>, %11, %cst_3 [1] : vector<24x32xf32> to vector<24xf32>
    %13 = vector.shape_cast %12 : vector<24xf32> to vector<24x1xf32>
    %14 = arith.divf %13, %10 : vector<24x1xf32>
    %15 = math.log %10 : vector<24x1xf32>
    %16 = arith.subf %14, %15 : vector<24x1xf32>
    %c1_i32 = arith.constant 1 : i32
    %17 = arith.muli %arg0, %c1_i32 : i32
    %18 = arith.addi %17, %arg1 : i32
    %c24_i32 = arith.constant 24 : i32
    %19 = arith.muli %18, %c24_i32 : i32
    %20 = tpu.iota {dimensions = array<i32: 0>} : vector<24x1xi32>
    %21 = vector.broadcast %19 : i32 to vector<24x1xi32>
    %22 = arith.addi %21, %20 : vector<24x1xi32>
    %c20_i32 = arith.constant 20 : i32
    %23 = vector.broadcast %c20_i32 : i32 to vector<24x1xi32>
    %24 = arith.cmpi slt, %22, %23 : vector<24x1xi32>
    %cst_4 = arith.constant 0.000000e+00 : f32
    %25 = vector.broadcast %cst_4 : f32 to vector<24x1xf32>
    %26 = arith.select %24, %16, %25 : vector<24x1xi1>, vector<24x1xf32>
    %c0_5 = arith.constant 0 : index
    %c0_6 = arith.constant 0 : index
    %27 = vector.load %arg3[%c0_5, %c0_6] : memref<1x1xf32, #tpu.memory_space<vmem>>, vector<1x1xf32>
    %cst_7 = arith.constant dense<0.000000e+00> : vector<1xf32>
    %28 = vector.multi_reduction <add>, %26, %cst_7 [0] : vector<24x1xf32> to vector<1xf32>
    %29 = vector.shape_cast %28 : vector<1xf32> to vector<1x1xf32>
    %30 = arith.addf %27, %29 : vector<1x1xf32>
    %c0_8 = arith.constant 0 : index
    %c0_9 = arith.constant 0 : index
    %31 = vector.load %arg3[%c0_8, %c0_9] : memref<1x1xf32, #tpu.memory_space<vmem>>, vector<1x1xf32>
    tpu.vector_store %arg3[%c0_8, %c0_9], %30 {strides = array<i32>} : memref<1x1xf32, #tpu.memory_space<vmem>>, vector<1x1xf32>,
    return
  }
  func.func @transform_0(%arg0: i32, %arg1: i32) -> (i32, i32) {
    %c1_i32 = arith.constant 1 : i32
    %0 = arith.muli %arg0, %c1_i32 : i32
    %1 = arith.addi %0, %arg1 : i32
    %c0_i32 = arith.constant 0 : i32
    %c0_i32_0 = arith.constant 0 : i32
    return %1, %c0_i32 : i32, i32
  }
  func.func @transform_1(%arg0: i32, %arg1: i32) -> (i32, i32) {
    %c0_i32 = arith.constant 0 : i32
    %c0_i32_0 = arith.constant 0 : i32
    return %arg0, %c0_i32 : i32, i32
  }
}

</mosaic_0001>

<bundles_post_ra>
// kernel: tpu_custom_call.1
= control target key start
LH: loop header
LB: loop body
LE: loop exit
PB: predicated region body
PF: predicated region fallthrough
CT: control target
= control target key end

     0   :  { %6 = vsyncpa [#allocation3], 0  ;;  %s257_s0 = inlined_call_operand.hbm [shape: f32[20,32], index: 0, kind: input, shape index: {}]   ;;  %s258_s1 = inlined_call_operand.hbm [shape: f32[1,1], index: 1, kind: output, shape index: {}]  }
   0x1   :  { %7 = vsyncpa [#allocation4], 0  ;;  %s207_s6 = smov [#allocation2]   ;;  %s159_s10 = scalar_lea.hbm %s257_s0, 384 }
   0x2   :  { %s17_s7 = sshll.u32 %s207_s6, 4  ;;  %p160_p0 = scmp.ne.s32.totalorder %s257_s0, %s159_s10  ;;  %s18_s7 = int_to_ptr.vmem [resolvable:$true] %s17_s7 }
   0x3   :  { %p163_p1 = scmp.lt.u32.totalorder %s159_s10, %s257_s0 }
   0x5   :  { %p165_p2 = pnand %p163_p1, %p160_p0 }
   0x7   :  { %168 = shalt.err (!%p165_p2)
}
   0x8   :  { %s169_s15 = scalar_lea.vmem %s18_s7, 384  ;;  %p174_p4 = scmp.lt.s32.totalorder %s18_s7, %s18_s7 }
   0x9   :  { %p170_p3 = scmp.ne.s32.totalorder %s18_s7, %s169_s15  ;;  %p175_p5 = scmp.lt.s32.totalorder %s169_s15, %s169_s15 }
   0xb   :  { %p176_p6 = por %p175_p5, %p174_p4 }
   0xd   :  { %p177_p7 = pnand %p176_p6, %p170_p3 }
   0xf   :  { %180 = shalt.err (!%p177_p7)
}
  0x10   :  { %s208_s16 = smov 128   ;;  %s209_s17 = smov 8  }
  0x11   :  { %23 = dma.hbm_to_vmem [thread:$0]  %s257_s0, 384, %s18_s7, [#allocation3], %s208_s16, %s208_s16, %s209_s17  }
  0x12   :  { %203 = dma.done.wait [#allocation3], 384  }
  0x13   :  { %204 = vsyncadd [#allocation3], 4294966912  ;;  %vm38_vm0 = vcmask 261120   ;;  %v37_v0 = vld [vmem:[#allocation2 + $0x10] sm:$0xff]  ;;  %v35_v1 = vld [vmem:[#allocation2] sm:$0xff]  ;;  %vm33_vm1 = vcmask 0   ;;  %v95_v31 = vlaneseq }
  0x14   :  { %v36_v2 = vld [vmem:[#allocation2 + $0x8] sm:$0xff]  ;;  %v45_v3 = vsel %vm38_vm0, %v37_v0, -inf  ;;  %v39_v4 = vsel %vm38_vm0, %v35_v1, -inf  ;;  %v210_v27 = vmov 0.0   ;;  %s211_s0 = smov [#allocation5]  }
  0x15   :  { %46 = vmax.xlane.f32.xlu1 %v45_v3  ;;  %40 = vmax.xlane.f32.xlu0 %v39_v4  ;;  %v42_v5 = vsel %vm38_vm0, %v36_v2, -inf  ;;  %34 = vst.msk [vmem:[#allocation5] sm:$0x1] %vm33_vm1, %v210_v27  ;;  %v96_v33 = vshrl.u32 %v95_v31, 7  ;;  %s127_s20 = sshll.u32 %s211_s0, 4  ;;  %s128_s20 = int_to_ptr.vmem [resolvable:$true] %s127_s20 }
  0x16   :  { %s181_s21 = scalar_lea.vmem %s128_s20, 16  ;;  %s185_s22 = scalar_lea.vmem %s128_s20, 32 }
  0x17   :  { %v98_v37 = vadd.s32 16, %v96_v33  ;;  %p182_p8 = scmp.ne.s32.totalorder %s128_s20, %s181_s21  ;;  %p186_p9 = scmp.lt.s32.totalorder %s128_s20, %s128_s20 }
  0x18   :  { %p187_p10 = scmp.lt.s32.totalorder %s185_s22, %s181_s21 }
  0x19   :  { %43 = vmax.xlane.f32.xlu0 %v42_v5  ;;  %vm105_vm2 = vcmp.lt.s32.totalorder %v98_v37, 20 }
  0x1a   :  { %p188_p11 = por %p187_p10, %p186_p9 }
  0x1c   :  { %v109_v60 = vld [vmem:[#allocation5] sm:$0x1]  ;;  %p189_p12 = pnand %p188_p11, %p182_p8 }
  0xa2   :  { %v47_v6 = vpop.xlane.xlu1 %46  ;;  %v41_v7 = vpop.xlane.xlu0 %40 }
  0xa3   :  { %v50_v8 = vsub.f32 %v37_v0, %v47_v6  ;;  %v48_v9 = vsub.f32 %v35_v1, %v41_v7 }
  0xa5   :  { %v51_v10 = vmul.f32 1.442695, %v48_v9  ;;  %v55_v11 = vmul.f32 1.442695, %v50_v8 }
  0xa6   :  { %v44_v12 = vpop.xlane.xlu0 %43 }
  0xa7   :  { %v49_v13 = vsub.f32 %v36_v2, %v44_v12  ;;  %141 = vpow2.f32 %v51_v10 }
  0xa8   :  { %143 = vpow2.f32 %v55_v11 }
  0xa9   :  { %v53_v14 = vmul.f32 1.442695, %v49_v13 }
  0xab   :  { %145 = vpow2.f32 %v53_v14 }
  0xb1   :  { %v142_v15 = vpop.eup %141 }
  0xb2   :  { %v57_v16 = vsel %vm38_vm0, %v142_v15, 0.0  ;;  %v144_v17 = vpop.eup %143  ;;  %v66_v21 = vmul.f32 %v142_v15, %v48_v9 }
  0xb3   :  { %58 = vadd.xlane.f32.xlu1 %v57_v16  ;;  %v63_v19 = vsel %vm38_vm0, %v144_v17, 0.0  ;;  %v68_v24 = vmul.f32 %v144_v17, %v50_v8 }
  0xb4   :  { %v69_v23 = vsel %vm38_vm0, %v66_v21, 0.0 }
  0xb5   :  { %v146_v18 = vpop.eup %145  ;;  %v75_v26 = vsel %vm38_vm0, %v68_v24, 0.0 }
  0xb6   :  { %v60_v20 = vsel %vm38_vm0, %v146_v18, 0.0  ;;  %v67_v22 = vmul.f32 %v146_v18, %v49_v13 }
  0xb7   :  { %61 = vadd.xlane.f32.xlu0 %v60_v20  ;;  %64 = vadd.xlane.f32.xlu1 %v63_v19 }
  0xb8   :  { %v72_v25 = vsel %vm38_vm0, %v67_v22, 0.0 }
  0xbb   :  { %70 = vadd.xlane.f32.xlu0 %v69_v23  ;;  %73 = vadd.xlane.f32.xlu1 %v72_v25 }
  0xbf   :  { %76 = vadd.xlane.f32.xlu0 %v75_v26 }
 0x140   :  { %v59_v28 = vpop.xlane.xlu1 %58 }
 0x141   :  { %147 = vrcp.f32 %v59_v28 }
 0x142   :  { %149 = vlog2.f32 %v59_v28 }
 0x144   :  { %v62_v29 = vpop.xlane.xlu0 %61  ;;  %v65_v30 = vpop.xlane.xlu1 %64 }
 0x145   :  { %151 = vrcp.f32 %v62_v29 }
 0x146   :  { %153 = vrcp.f32 %v65_v30 }
 0x147   :  { %155 = vlog2.f32 %v65_v30 }
 0x148   :  { %157 = vlog2.f32 %v62_v29  ;;  %v71_v32 = vpop.xlane.xlu0 %70  ;;  %v74_v39 = vpop.xlane.xlu1 %73 }
 0x14b   :  { %v148_v34 = vpop.eup %147 }
 0x14c   :  { %v150_v35 = vpop.eup %149  ;;  %v77_v40 = vpop.xlane.xlu0 %76  ;;  %v79_v44 = vmul.f32 %v148_v34, %v71_v32 }
 0x14d   :  { %v85_v43 = vmul.f32 0.6931472, %v150_v35 }
 0x14f   :  { %v152_v36 = vpop.eup %151  ;;  %v90_v51 = vsub.f32 %v79_v44, %v85_v43 }
 0x150   :  { %v154_v38 = vpop.eup %153  ;;  %v81_v42 = vmul.f32 %v152_v36, %v74_v39 }
 0x151   :  { %v156_v41 = vpop.eup %155  ;;  %v83_v45 = vmul.f32 %v154_v38, %v77_v40 }
 0x152   :  { %v158_v46 = vpop.eup %157  ;;  %v89_v47 = vmul.f32 0.6931472, %v156_v41 }
 0x153   :  { %v87_v48 = vmul.f32 0.6931472, %v158_v46 }
 0x154   :  { %v92_v49 = vsub.f32 %v83_v45, %v89_v47 }
 0x155   :  { %v91_v50 = vsub.f32 %v81_v42, %v87_v48 }
 0x156   :  { %v108_v52 = vsel %vm105_vm2, %v92_v49, 0.0 }
 0x157   :  { %v110_v53 = vadd.f32 %v91_v50, %v90_v51 }
 0x159   :  { %v111_v54 = vadd.f32 %v110_v53, %v108_v52 }
 0x15b   :  { %v112_v55 = vrot.slane %v111_v54, 4 }
 0x15d   :  { %v113_v56 = vadd.f32 %v112_v55, %v111_v54 }
 0x15f   :  { %v114_v57 = vrot.slane %v113_v56, 2 }
 0x161   :  { %v115_v58 = vadd.f32 %v114_v57, %v113_v56 }
 0x163   :  { %v116_v59 = vrot.slane %v115_v58, 1 }
 0x165   :  { %v117_v61 = vadd.f32 %v116_v59, %v115_v58 }
 0x167   :  { %v118_v62 = vadd.f32 %v117_v61, %v109_v60 }
 0x169   :  { %120 = vst.msk [vmem:[#allocation5] sm:$0x1] %vm33_vm1, %v118_v62 }
 0x16a   :  { %192 = shalt.err (!%p189_p12)
}
 0x16b   :  { %s193_s25 = scalar_lea.hbm %s258_s1, 16 }
 0x16c   :  { %p194_p13 = scmp.ne.s32.totalorder %s258_s1, %s193_s25  ;;  %p197_p0 = scmp.lt.u32.totalorder %s193_s25, %s258_s1 }
 0x16e   :  { %p199_p1 = pnand %p197_p0, %p194_p13 }
 0x170   :  { %202 = shalt.err (!%p199_p1)
}
 0x171   :  { %130 = dma.vmem_to_hbm [thread:$0]  %s128_s20, 16, %s258_s1, [#allocation4]  }
 0x172   :  { %205 = dma.done.wait [#allocation4], 16  }
 0x173   :  { %206 = vsyncadd [#allocation4], 4294967280 }
 0x174   :  { %134 = vsyncpa [#allocation3], 1 }
 0x175   :  { %135 = vsyncpa [#allocation4], 1 }

</bundles_post_ra>
